<compile_context>
chip_gen: v7x
topology: tpu7x:2x2x1
jax: 0.10.0
libtpu: 0.0.40
codegen_flags: <defaults>
</compile_context>

<pallas_src>
import functools

import jax
import jax.numpy as jnp
from jax import lax
from jax.experimental import pallas as pl
from jax.experimental.pallas import tpu as pltpu


def _label_smoothing_kernel(pred_ref, target_ref, out_ref, *,
                            classes, smoothing, n_rows, block_rows):
    confidence = 1.0 - smoothing
    off_value = smoothing / (classes - 1)
    i = pl.program_id(0)

    @pl.when(i == 0)
    def _():
        out_ref[0, 0] = 0.0

    x = pred_ref[...].astype(jnp.float32)            # (TN, C)
    tgt = target_ref[...]                            # (TN, 1) int32

    # Stable log-softmax pieces: one exp per element; lane reductions -> XLU.
    m = jnp.max(x, axis=-1, keepdims=True)                              # (TN,1)
    lse = jnp.log(jnp.sum(jnp.exp(x - m), axis=-1, keepdims=True))      # (TN,1)
    row_sum = jnp.sum(x, axis=-1, keepdims=True)                        # (TN,1)

    # x[n, target[n]] via a single masked lane reduce (scatter_ equivalent).
    col_ids = lax.broadcasted_iota(jnp.int32, x.shape, dimension=1)
    x_tgt = jnp.sum(jnp.where(col_ids == tgt, x, 0.0),
                    axis=-1, keepdims=True)                             # (TN,1)

    # per_row = -sum_c true_dist * logp, in closed form.
    mlse = m + lse
    per_row = (off_value * (classes * mlse - row_sum)
               - (confidence - off_value) * (x_tgt - mlse))             # (TN,1)

    # Mask rows past the true batch size (last partial / padded block).
    row_ids = i * block_rows + lax.broadcasted_iota(jnp.int32, per_row.shape, 0)
    per_row = jnp.where(row_ids < n_rows, per_row, 0.0)

    out_ref[0, 0] += jnp.sum(per_row)

    @pl.when(i == pl.num_programs(0) - 1)
    def _():
        out_ref[0, 0] = out_ref[0, 0] / n_rows


def _round_up(x, m):
    return ((x + m - 1) // m) * m


def label_smoothing_loss(pred, target, classes, smoothing=0.0, block_rows=None):
    """pred: (N, C) float (f32 or bf16), target: (N,) int -> scalar f32 loss."""
    n, c = pred.shape
    assert c == classes
    assert classes > 1, "smoothing/(classes-1) undefined for classes == 1"
    target_col = target.astype(jnp.int32).reshape(n, 1)

    itemsize = jnp.dtype(pred.dtype).itemsize
    row_align = max(8, 32 // itemsize)            # (8,128) f32 tile / (16,128) bf16

    if block_rows is None:
        budget = 6 << 20                          # bytes per pipelined pred buffer
        rows_fit = (budget // max(c * itemsize, 1)) // row_align * row_align
        block_rows = max(row_align, min(4096, rows_fit))
    tn = min(_round_up(n, row_align), _round_up(block_rows, row_align))
    grid = (pl.cdiv(n, tn),)

    kernel = functools.partial(
        _label_smoothing_kernel,
        classes=classes, smoothing=float(smoothing), n_rows=n, block_rows=tn)

    out = pl.pallas_call(
        kernel,
        out_shape=jax.ShapeDtypeStruct((1, 1), jnp.float32),
        grid_spec=pltpu.PrefetchScalarGridSpec(
            num_scalar_prefetch=0,
            grid=grid,
            in_specs=[
                pl.BlockSpec((tn, c), lambda i: (i, 0)),
                pl.BlockSpec((tn, 1), lambda i: (i, 0)),
            ],
            # Scalar accumulator/output lives unblocked in SMEM: no per-step
            # lane-masked VMEM writeback, single scalar-slot store.
            out_specs=pl.BlockSpec(memory_space=pltpu.MemorySpace.SMEM),
        ),
        compiler_params=pltpu.CompilerParams(
            dimension_semantics=("arbitrary",),   # running accumulation axis
            vmem_limit_bytes=32 << 20,
        ),
    )(pred, target_col)
    return out[0, 0]


def _reference(pred, target, classes, smoothing):
    # Pure-JAX reference mirroring the PyTorch forward.
    logp = jax.nn.log_softmax(pred.astype(jnp.float32), axis=-1)
    true_dist = jnp.full_like(logp, smoothing / (classes - 1))
    true_dist = true_dist.at[jnp.arange(pred.shape[0]), target].set(1.0 - smoothing)
    return jnp.mean(jnp.sum(-true_dist * logp, axis=-1))


if __name__ == "__main__":
    key = jax.random.PRNGKey(0)
    k_pred, k_tgt = jax.random.split(key)

    N, C = 20, 32           # N deliberately NOT a multiple of the block size
    smoothing = 0.1

    pred = jax.random.normal(k_pred, (N, C), dtype=jnp.float32)
    target = jax.random.randint(k_tgt, (N,), 0, C, dtype=jnp.int32)

    # Small forced block so the demo exercises multi-step accumulation and the
    # padded-row mask in the last (partial) block: grid = ceil(20/8) = 3 steps.
    loss = label_smoothing_loss(pred, target, classes=C, smoothing=smoothing,
                                block_rows=8)
    loss = jax.block_until_ready(loss)
    ref = _reference(pred, target, C, smoothing)
    assert jnp.allclose(loss, ref, atol=1e-5, rtol=1e-5), (loss, ref)

    # bf16 logits path (half the HBM traffic); reference uses the same bf16 values.
    pred_bf16 = pred.astype(jnp.bfloat16)
    loss_bf16 = label_smoothing_loss(pred_bf16, target, classes=C,
                                     smoothing=smoothing, block_rows=16)
    loss_bf16 = jax.block_until_ready(loss_bf16)
    ref_bf16 = _reference(pred_bf16.astype(jnp.float32), target, C, smoothing)
    assert jnp.allclose(loss_bf16, ref_bf16, atol=1e-4, rtol=1e-4), (loss_bf16, ref_bf16)

    print("KERNEL_OK")
</pallas_src>

<mosaic_0001>
module attributes {stable_mosaic.version = 11 : i64} {
  func.func @_label_smoothing_kernel(%arg0: i32, %arg1: memref<8x32xf32, #tpu.memory_space<vmem>>, %arg2: memref<8x1xi32, #tpu.memory_space<vmem>>, %arg3: memref<1x1xf32, #tpu.memory_space<smem>>) attributes {dimension_semantics = [#tpu.dimension_semantics<arbitrary>], iteration_bounds = array<i64: 3>, scalar_prefetch = 0 : i64, scratch_operands = 0 : i64, tpu.core_type = #tpu.core_type<tc>, window_params = [{transform_indices = @transform_0, window_bounds = array<i64: 8, 32>}, {transform_indices = @transform_1, window_bounds = array<i64: 8, 1>}, {transform_indices = @transform_2, window_bounds = array<i64: 1, 1>}]} {
    %c0_i32 = arith.constant 0 : i32
    %0 = arith.cmpi eq, %arg0, %c0_i32 : i32
    %1 = arith.extui %0 : i1 to i32
    %c0_i32_0 = arith.constant 0 : i32
    %2 = arith.cmpi ne, %1, %c0_i32_0 : i32
    scf.if %2 {
      %cst_18 = arith.constant 0.000000e+00 : f32
      %c0_19 = arith.constant 0 : index
      %c0_20 = arith.constant 0 : index
      %50 = memref.load %arg3[%c0_19, %c0_20] : memref<1x1xf32, #tpu.memory_space<smem>>
      memref.store %cst_18, %arg3[%c0_19, %c0_20] : memref<1x1xf32, #tpu.memory_space<smem>>
    } else {
    }
    %c0 = arith.constant 0 : index
    %c0_1 = arith.constant 0 : index
    %3 = vector.load %arg1[%c0, %c0_1] : memref<8x32xf32, #tpu.memory_space<vmem>>, vector<8x32xf32>
    %c0_2 = arith.constant 0 : index
    %c0_3 = arith.constant 0 : index
    %4 = vector.load %arg2[%c0_2, %c0_3] : memref<8x1xi32, #tpu.memory_space<vmem>>, vector<8x1xi32>
    %cst = arith.constant dense<0xFF800000> : vector<8xf32>
    %5 = vector.multi_reduction <maximumf>, %3, %cst [1] : vector<8x32xf32> to vector<8xf32>
    %6 = vector.shape_cast %5 : vector<8xf32> to vector<8x1xf32>
    %7 = vector.broadcast %6 : vector<8x1xf32> to vector<8x32xf32>
    %8 = arith.subf %3, %7 : vector<8x32xf32>
    %9 = math.exp %8 : vector<8x32xf32>
    %cst_4 = arith.constant dense<0.000000e+00> : vector<8xf32>
    %10 = vector.multi_reduction <add>, %9, %cst_4 [1] : vector<8x32xf32> to vector<8xf32>
    %11 = vector.shape_cast %10 : vector<8xf32> to vector<8x1xf32>
    %12 = math.log %11 : vector<8x1xf32>
    %cst_5 = arith.constant dense<0.000000e+00> : vector<8xf32>
    %13 = vector.multi_reduction <add>, %3, %cst_5 [1] : vector<8x32xf32> to vector<8xf32>
    %14 = vector.shape_cast %13 : vector<8xf32> to vector<8x1xf32>
    %15 = tpu.iota {dimensions = array<i32: 1>} : vector<8x32xi32>
    %16 = vector.broadcast %4 : vector<8x1xi32> to vector<8x32xi32>
    %17 = arith.cmpi eq, %15, %16 : vector<8x32xi32>
    %cst_6 = arith.constant 0.000000e+00 : f32
    %18 = vector.broadcast %cst_6 : f32 to vector<8x32xf32>
    %19 = arith.select %17, %3, %18 : vector<8x32xi1>, vector<8x32xf32>
    %cst_7 = arith.constant dense<0.000000e+00> : vector<8xf32>
    %20 = vector.multi_reduction <add>, %19, %cst_7 [1] : vector<8x32xf32> to vector<8xf32>
    %21 = vector.shape_cast %20 : vector<8xf32> to vector<8x1xf32>
    %22 = arith.addf %6, %12 : vector<8x1xf32>
    %cst_8 = arith.constant 3.200000e+01 : f32
    %23 = vector.broadcast %cst_8 : f32 to vector<8x1xf32>
    %24 = arith.mulf %23, %22 : vector<8x1xf32>
    %25 = arith.subf %24, %14 : vector<8x1xf32>
    %cst_9 = arith.constant 0.0032258064 : f32
    %26 = vector.broadcast %cst_9 : f32 to vector<8x1xf32>
    %27 = arith.mulf %26, %25 : vector<8x1xf32>
    %28 = arith.subf %21, %22 : vector<8x1xf32>
    %cst_10 = arith.constant 0.896774172 : f32
    %29 = vector.broadcast %cst_10 : f32 to vector<8x1xf32>
    %30 = arith.mulf %29, %28 : vector<8x1xf32>
    %31 = arith.subf %27, %30 : vector<8x1xf32>
    %c8_i32 = arith.constant 8 : i32
    %32 = arith.muli %arg0, %c8_i32 : i32
    %33 = tpu.iota {dimensions = array<i32: 0>} : vector<8x1xi32>
    %34 = vector.broadcast %32 : i32 to vector<8x1xi32>
    %35 = arith.addi %34, %33 : vector<8x1xi32>
    %c20_i32 = arith.constant 20 : i32
    %36 = vector.broadcast %c20_i32 : i32 to vector<8x1xi32>
    %37 = arith.cmpi slt, %35, %36 : vector<8x1xi32>
    %cst_11 = arith.constant 0.000000e+00 : f32
    %38 = vector.broadcast %cst_11 : f32 to vector<8x1xf32>
    %39 = arith.select %37, %31, %38 : vector<8x1xi1>, vector<8x1xf32>
    %c0_12 = arith.constant 0 : index
    %c0_13 = arith.constant 0 : index
    %40 = memref.load %arg3[%c0_12, %c0_13] : memref<1x1xf32, #tpu.memory_space<smem>>
    %41 = vector.shape_cast %39 : vector<8x1xf32> to vector<1x8x1xf32>
    %cst_14 = arith.constant dense<0.000000e+00> : vector<1xf32>
    %42 = vector.multi_reduction <add>, %41, %cst_14 [1, 2] : vector<1x8x1xf32> to vector<1xf32>
    %43 = vector.shape_cast %42 : vector<1xf32> to vector<1x1x1xf32>
    %44 = vector.extract %43[0, 0, 0] : f32 from vector<1x1x1xf32>
    %45 = arith.addf %40, %44 : f32
    %c0_15 = arith.constant 0 : index
    %c0_16 = arith.constant 0 : index
    %46 = memref.load %arg3[%c0_15, %c0_16] : memref<1x1xf32, #tpu.memory_space<smem>>
    memref.store %45, %arg3[%c0_15, %c0_16] : memref<1x1xf32, #tpu.memory_space<smem>>
    %c2_i32 = arith.constant 2 : i32
    %47 = arith.cmpi eq, %arg0, %c2_i32 : i32
    %48 = arith.extui %47 : i1 to i32
    %c0_i32_17 = arith.constant 0 : i32
    %49 = arith.cmpi ne, %48, %c0_i32_17 : i32
    scf.if %49 {
      %c0_18 = arith.constant 0 : index
      %c0_19 = arith.constant 0 : index
      %50 = memref.load %arg3[%c0_18, %c0_19] : memref<1x1xf32, #tpu.memory_space<smem>>
      %cst_20 = arith.constant 2.000000e+01 : f32
      %51 = arith.divf %50, %cst_20 : f32
      %c0_21 = arith.constant 0 : index
      %c0_22 = arith.constant 0 : index
      %52 = memref.load %arg3[%c0_21, %c0_22] : memref<1x1xf32, #tpu.memory_space<smem>>
      memref.store %51, %arg3[%c0_21, %c0_22] : memref<1x1xf32, #tpu.memory_space<smem>>
    } else {
    }
    return
  }
  func.func @transform_0(%arg0: i32) -> (i32, i32) {
    %c0_i32 = arith.constant 0 : i32
    %c0_i32_0 = arith.constant 0 : i32
    return %arg0, %c0_i32 : i32, i32
  }
  func.func @transform_1(%arg0: i32) -> (i32, i32) {
    %c0_i32 = arith.constant 0 : i32
    %c0_i32_0 = arith.constant 0 : i32
    return %arg0, %c0_i32 : i32, i32
  }
  func.func @transform_2(%arg0: i32) -> (i32, i32) {
    %c0_i32 = arith.constant 0 : i32
    %c0_i32_0 = arith.constant 0 : i32
    %c0_i32_1 = arith.constant 0 : i32
    return %c0_i32, %c0_i32_0 : i32, i32
  }
}

</mosaic_0001>

<bundles_post_ra>
// kernel: tpu_custom_call.1
= control target key start
LH: loop header
LB: loop body
LE: loop exit
PB: predicated region body
PF: predicated region fallthrough
CT: control target
= control target key end

     0   :  { %7 = vsyncpa [#allocation3], 0  ;;  %s357_s9 = smov 0   ;;  %s407_s0 = inlined_call_operand.vmem [shape: f32[20,32], index: 0, kind: input, shape index: {}]   ;;  %s408_s1 = inlined_call_operand.vmem [shape: s32[20,1], index: 1, kind: input, shape index: {}]   ;;  %s409_s2 = inlined_call_operand.hbm [shape: f32[1,1], index: 2, kind: output, shape index: {}]  }
   0x1 LB: > { %s363_s10 = sadd.s32 4294967295, %s337_s9   ;;  %p275_p0 = scmp.ge.s32.totalorder %s337_s9, 1  ;;  %s337_s9 = sphi %s357_s9, %s13_s9  }
   0x2   : > { %p116_p1 = scmp.lt.s32.totalorder %s337_s9, 4 }
   0x4   : > { %p117_p2 = pnand %p275_p0, %p116_p1 }
   0x5   : > { %p136_p3 = scmp.lt.s32.totalorder (!%p117_p2), %s363_s10, 2  ;;  %v339_v0 = vmov (!%p117_p2), 0   ;;  %vm152_vm0 = vcmask (!%p117_p2), 261120   ;;  %v167_v7 = vlaneseq (!%p117_p2)  ;;  %s279_s19 = sshll.u32 (!%p117_p2), %s363_s10, 3  ;;  %vm192_vm3 = vcmask (!%p117_p2), 7168  }
   0x6   : > { %120 = sbr.rel (%p117_p2) target bundleno = 559 (0x22f), region = 28  ;;  %310 = vset.pattern.permute.xlu0 (!%p117_p2), %v339_v0  ;;  %v187_v22 = vstv (!%p117_p2), %s279_s19  ;;  %p295_p4 = scmp.eq.s32.totalorder (!%p117_p2), %s363_s10, 0 }
   0x7   : > { %v168_v8 = vand.u32 (!%p117_p2), 127, %v167_v7  ;;  %v186_v20 = vshrl.u32 (!%p117_p2), %v167_v7, 7  ;;  %s340_s20 = smov (!%p117_p2), 0.0   ;;  %p296_p5 = scmp.eq.s32.totalorder (!%p117_p2), %s363_s10, 2 }
   0x8   : > { %s315_s27 = scalar_lea.hbm (!%p117_p2), %s409_s2, 16 }
   0x9   : > { %v188_v25 = vadd.s32 (!%p117_p2), %v187_v22, %v186_v20  ;;  %p316_p6 = scmp.ne.s32.totalorder (!%p117_p2), %s409_s2, %s315_s27  ;;  %p321_p9 = scmp.lt.u32.totalorder (!%p117_p2), %s315_s27, %s409_s2 }
   0xb   : > { %vm189_vm2 = vcmp.lt.s32.totalorder (!%p117_p2), %v188_v25, 20  ;;  %p317_p7 = pnand (!%p117_p2), %p316_p6, %p296_p5 }
   0xd   : > { %s137_s11 = scalar_select %p136_p3, %s363_s10, 2 }
   0xe   : > { %288 = sst [smem:[#allocation2]] (%p295_p4), %s340_s20  ;;  %p318_p8 = pneg %p317_p7 }
   0xf   : > { %s276_s12 = sshll.u32 %s137_s11, 3  ;;  %s191_s21 = sld [smem:[#allocation2]] }
  0x10   : > { %s139_s15 = scalar_lea.vmem %s407_s0, %s276_s12  ;;  %s143_s18 = scalar_lea.vmem %s408_s1, %s276_s12 }
  0x11   : > { %v150_v1 = vld [vmem:[%s139_s15] sm:$0xff]  ;;  %p323_p10 = pnand %p321_p9, %p318_p8 }
  0x12   : > { %v153_v2 = vsel %vm152_vm0, %v150_v1, -inf  ;;  %v151_v3 = vld [vmem:[%s143_s18] sm:$0xff]  ;;  %v164_v12 = vsel %vm152_vm0, %v150_v1, 0.0 }
  0x13   : > { %154 = vmax.xlane.f32.xlu0 %v153_v2 }
  0x29   : > { %170 = vperm.xlu0 %310, %v151_v3  }
  0xa0   : > { %v155_v4 = vpop.xlane.xlu0 %154 }
  0xa1   : > { %v156_v5 = vsub.f32 %v150_v1, %v155_v4 }
  0xa3   : > { %v157_v6 = vmul.f32 1.442695, %v156_v5 }
  0xa5   : > { %311 = vpow2.f32 %v157_v6 }
  0xa8   : > { %v171_v9 = vpop.permute.xlu0 %170 }
  0xa9   : > { %vm172_vm1 = vcmp.eq.s32.totalorder %v168_v8, %v171_v9 }
  0xaa   : > { %v173_v13 = vsel %vm172_vm1, %v150_v1, 0.0 }
  0xab   : > { %v174_v14 = vsel %vm152_vm0, %v173_v13, 0.0 }
  0xaf   : > { %v312_v10 = vpop.eup %311 }
  0xb0   : > { %v159_v11 = vsel %vm152_vm0, %v312_v10, 0.0 }
  0xb1   : > { %160 = vadd.xlane.f32.xlu1 %v159_v11 }
  0xb5   : > { %165 = vadd.xlane.f32.xlu1 %v164_v12 }
  0xb9   : > { %175 = vadd.xlane.f32.xlu1 %v174_v14 }
 0x13e   : > { %v161_v15 = vpop.xlane.xlu1 %160 }
 0x13f   : > { %313 = vlog2.f32 %v161_v15 }
 0x142   : > { %v166_v16 = vpop.xlane.xlu1 %165 }
 0x146   : > { %v176_v19 = vpop.xlane.xlu1 %175 }
 0x149   : > { %v314_v17 = vpop.eup %313 }
 0x14a   : > { %v163_v18 = vmul.f32 0.6931472, %v314_v17 }
 0x14c   : > { %v177_v21 = vadd.f32 %v163_v18, %v155_v4 }
 0x14e   : > { %v178_v23 = vmul.f32 32.0, %v177_v21  ;;  %v181_v24 = vsub.f32 %v176_v19, %v177_v21 }
 0x150   : > { %v179_v26 = vsub.f32 %v178_v23, %v166_v16  ;;  %v182_v28 = vmul.f32 0.8967742, %v181_v24 }
 0x152   : > { %v180_v27 = vmul.f32 0.0032258064, %v179_v26 }
 0x154   : > { %v183_v29 = vsub.f32 %v180_v27, %v182_v28 }
 0x156   : > { %v190_v30 = vsel %vm189_vm2, %v183_v29, 0.0 }
 0x157   : > { %v193_v31 = vsel %vm192_vm3, %v190_v30, 0.0 }
 0x158   : > { %194 = vadd.xlane.f32.xlu1 %v193_v31 }
 0x1e5   : > { %v195_v32 = vpop.xlane.xlu1 %194 }
 0x1e6   : > { %v196_v33 = vrot.slane %v195_v32, 4 }
 0x1e8   : > { %v197_v34 = vadd.f32 %v196_v33, %v195_v32 }
 0x1ea   : > { %v198_v35 = vrot.slane %v197_v34, 2 }
 0x1ec   : > { %v199_v36 = vadd.f32 %v198_v35, %v197_v34 }
 0x1ee   : > { %v200_v37 = vrot.slane %v199_v36, 1 }
 0x1f0   : > { %v201_v38 = vadd.f32 %v200_v37, %v199_v36 }
 0x1f2   : > { %285 = vpush %v201_v38 }
 0x223   : > { %s286_s22 = spop %285 }
 0x224   : > { %s203_s23 = sadd.f32 %s286_s22, %s191_s21 }
 0x226   : > { %205 = sst [smem:[#allocation2]] %s203_s23  ;;  %s213_s24 = smul.f32 0.05, %s203_s23 }
 0x228   : > { %290 = sst [smem:[#allocation2]] (%p296_p5), %s213_s24 }
 0x229   : > { %326 = shalt.err (!%p323_p10)
}
 0x22a   : > { %s341_s4 = smov [#allocation2]  }
 0x22b   : > { %292 = dma.smem_to_hbm (%p296_p5), %s341_s4, 16, %s409_s2, [#allocation3]  }
 0x22c   : > { %332 = dma.done.wait (%p296_p5), [#allocation3], 16  }
 0x22d   : > { %334 = vsyncadd (%p296_p5), [#allocation3], 4294967280 }
 0x22e   : > { %228 = sfence }
 0x22f PF: > { %s13_s9 = sadd.s32 1, %s337_s9  }
 0x230   : > { %p10_p11 = scmp.ge.s32.totalorder %s13_s9, 5  }
 0x232   :  { %12 = sbr.rel (!%p10_p11) target bundleno = 1 (0x1), region = 68 }
 0x239   :  { %234 = vsyncpa [#allocation3], 1 }
 0x23a   :  { %236 = vsyncpa [#allocation3 + $0x1], 1 }

</bundles_post_ra>
